<compile_context>
chip_gen: v7x
topology: tpu7x:2x2x1
jax: 0.10.0
libtpu: 0.0.40
codegen_flags: <defaults>
</compile_context>

<pallas_src>
import functools

import jax
import jax.numpy as jnp
from jax.experimental import pallas as pl
from jax.experimental.pallas import tpu as pltpu

_INV_SQRT2 = 0.7071067811865476
_EPS = 1e-6


def _mlp_kernel(x_ref, gamma_ref, beta_ref, w1t_ref, b1_ref, w2t_ref, b2_ref,
                scale_ref, o_ref):
    # x block: (1, C, T) -> (C, T); channels in sublanes, pixels in lanes.
    x = x_ref[0].astype(jnp.float32)                         # (C, T)

    # --- LayerNorm over channel dim (channels_first semantics) ---
    u = jnp.mean(x, axis=0, keepdims=True)                   # (1, T)
    xc = x - u
    s = jnp.mean(xc * xc, axis=0, keepdims=True)             # biased variance
    xn = xc * jax.lax.rsqrt(s + _EPS)
    xn = xn * gamma_ref[...] + beta_ref[...]                 # (C,1) broadcast

    # --- fc1 (1x1 conv) + exact GELU ---
    h = jnp.dot(w1t_ref[...], xn, preferred_element_type=jnp.float32)  # (I, T)
    h = h + b1_ref[...]
    h = 0.5 * h * (1.0 + jax.lax.erf(h * _INV_SQRT2))

    # --- fc2 (1x1 conv) ---
    y = jnp.dot(w2t_ref[...], h, preferred_element_type=jnp.float32)   # (C, T)
    y = y + b2_ref[...]

    # --- scale + residual (lane-dense store, T is a multiple of 128) ---
    o_ref[0] = (y * scale_ref[...] + x).astype(o_ref.dtype)


@functools.partial(jax.jit, static_argnames=("tile_hw",))
def mlp_forward(x_nchw, gamma, beta, w1, b1, w2, b2, scale, *, tile_hw=2048):
    """x_nchw: (B, C, H, W) float32.  Returns (B, C, H, W)."""
    B, C, H, W = x_nchw.shape
    I = w1.shape[1]
    HW = H * W

    # Free reshape (no transpose): (B, C, H, W) -> (B, C, H*W)
    x3d = x_nchw.reshape(B, C, HW)

    # Effective pixel tile: multiple of 128, no larger than the (padded) pixel
    # count.  Pad the pixel dim so the grid covers it exactly (no asserts).
    t = max(128, (min(tile_hw, ((HW + 127) // 128) * 128) // 128) * 128)
    hw_pad = ((HW + t - 1) // t) * t
    if hw_pad != HW:
        x3d = jnp.pad(x3d, ((0, 0), (0, 0), (0, hw_pad - HW)))
    n_blocks = hw_pad // t

    col = lambda v: v.reshape(-1, 1).astype(jnp.float32)     # (C,1)/(I,1)

    out3d = pl.pallas_call(
        _mlp_kernel,
        out_shape=jax.ShapeDtypeStruct((B, C, hw_pad), x_nchw.dtype),
        grid_spec=pltpu.PrefetchScalarGridSpec(
            num_scalar_prefetch=0,
            grid=(B, n_blocks),
            in_specs=[
                pl.BlockSpec((1, C, t), lambda b, j: (b, 0, j)),   # x
                pl.BlockSpec((C, 1), lambda b, j: (0, 0)),         # gamma
                pl.BlockSpec((C, 1), lambda b, j: (0, 0)),         # beta
                pl.BlockSpec((I, C), lambda b, j: (0, 0)),         # w1^T
                pl.BlockSpec((I, 1), lambda b, j: (0, 0)),         # b1
                pl.BlockSpec((C, I), lambda b, j: (0, 0)),         # w2^T
                pl.BlockSpec((C, 1), lambda b, j: (0, 0)),         # b2
                pl.BlockSpec((C, 1), lambda b, j: (0, 0)),         # scale
            ],
            out_specs=pl.BlockSpec((1, C, t), lambda b, j: (b, 0, j)),
        ),
        compiler_params=pltpu.CompilerParams(
            # Both grid axes independent -> megacore sharding on v7x.
            dimension_semantics=("parallel", "parallel")),
    )(x3d,
      col(gamma), col(beta),
      jnp.transpose(w1).astype(jnp.float32), col(b1),
      jnp.transpose(w2).astype(jnp.float32), col(b2),
      col(scale))

    if hw_pad != HW:
        out3d = out3d[:, :, :HW]
    return out3d.reshape(B, C, H, W)


def _reference(x_nchw, gamma, beta, w1, b1, w2, b2, scale):
    """Pure-JAX reference mirroring the PyTorch module."""
    x = x_nchw.astype(jnp.float32)
    shortcut = x
    u = jnp.mean(x, axis=1, keepdims=True)
    s = jnp.mean((x - u) ** 2, axis=1, keepdims=True)
    xn = (x - u) / jnp.sqrt(s + _EPS)
    xn = gamma[None, :, None, None] * xn + beta[None, :, None, None]
    h = jnp.einsum("bchw,ci->bihw", xn, w1) + b1[None, :, None, None]
    h = 0.5 * h * (1.0 + jax.lax.erf(h * _INV_SQRT2))
    y = jnp.einsum("bihw,ic->bchw", h, w2) + b2[None, :, None, None]
    return y * scale[None, :, None, None] + shortcut


if __name__ == "__main__":
    # Small deterministic config: n_feats=32 (<64) -> i_feats = 32 // 4 = 8
    B, C, H, W = 2, 32, 16, 16
    I = C // 4

    key = jax.random.PRNGKey(0)
    kx, k1, k2, k3, k4, k5 = jax.random.split(key, 6)

    x = jax.random.normal(kx, (B, C, H, W), dtype=jnp.float32)

    # LayerNorm params as in __init__ (ones / zeros)
    gamma = jnp.ones((C,), jnp.float32)
    beta = jnp.zeros((C,), jnp.float32)
    # Conv weights/biases stored as (C_in, C_out) since 1x1 conv == matmul.
    w1 = 0.1 * jax.random.normal(k1, (C, I), dtype=jnp.float32)
    b1 = 0.1 * jax.random.normal(k2, (I,), dtype=jnp.float32)
    w2 = 0.1 * jax.random.normal(k3, (I, C), dtype=jnp.float32)
    b2 = 0.1 * jax.random.normal(k4, (C,), dtype=jnp.float32)
    # Module inits scale to zeros; use small random values here so the
    # MLP branch actually contributes to the output check.
    scale = 0.5 * jax.random.normal(k5, (C,), dtype=jnp.float32)

    out = mlp_forward(x, gamma, beta, w1, b1, w2, b2, scale)
    out = jax.block_until_ready(out)

    ref = _reference(x, gamma, beta, w1, b1, w2, b2, scale)
    assert out.shape == (B, C, H, W)
    assert jnp.allclose(out, ref, atol=1e-4, rtol=1e-4), (
        float(jnp.max(jnp.abs(out - ref))))

    print("KERNEL_OK")
</pallas_src>

<mosaic_0001>
module attributes {stable_mosaic.version = 11 : i64} {
  func.func @_mlp_kernel(%arg0: i32, %arg1: i32, %arg2: memref<1x32x256xf32, #tpu.memory_space<vmem>>, %arg3: memref<32x1xf32, #tpu.memory_space<vmem>>, %arg4: memref<32x1xf32, #tpu.memory_space<vmem>>, %arg5: memref<8x32xf32, #tpu.memory_space<vmem>>, %arg6: memref<8x1xf32, #tpu.memory_space<vmem>>, %arg7: memref<32x8xf32, #tpu.memory_space<vmem>>, %arg8: memref<32x1xf32, #tpu.memory_space<vmem>>, %arg9: memref<32x1xf32, #tpu.memory_space<vmem>>, %arg10: memref<1x32x256xf32, #tpu.memory_space<vmem>>) attributes {dimension_semantics = [#tpu.dimension_semantics<parallel>, #tpu.dimension_semantics<parallel>], iteration_bounds = array<i64: 2, 1>, scalar_prefetch = 0 : i64, scratch_operands = 0 : i64, tpu.core_type = #tpu.core_type<tc>, window_params = [{transform_indices = @transform_0, window_bounds = array<i64: 1, 32, 256>}, {pipeline_mode = #tpu.pipeline_mode<synchronous>, transform_indices = @transform_1, window_bounds = array<i64: 32, 1>}, {pipeline_mode = #tpu.pipeline_mode<synchronous>, transform_indices = @transform_2, window_bounds = array<i64: 32, 1>}, {pipeline_mode = #tpu.pipeline_mode<synchronous>, transform_indices = @transform_3, window_bounds = array<i64: 8, 32>}, {pipeline_mode = #tpu.pipeline_mode<synchronous>, transform_indices = @transform_4, window_bounds = array<i64: 8, 1>}, {pipeline_mode = #tpu.pipeline_mode<synchronous>, transform_indices = @transform_5, window_bounds = array<i64: 32, 8>}, {pipeline_mode = #tpu.pipeline_mode<synchronous>, transform_indices = @transform_6, window_bounds = array<i64: 32, 1>}, {pipeline_mode = #tpu.pipeline_mode<synchronous>, transform_indices = @transform_7, window_bounds = array<i64: 32, 1>}, {transform_indices = @transform_8, window_bounds = array<i64: 1, 32, 256>}]} {
    %c0 = arith.constant 0 : index
    %c0_0 = arith.constant 0 : index
    %c0_1 = arith.constant 0 : index
    %0 = vector.load %arg2[%c0, %c0_0, %c0_1] : memref<1x32x256xf32, #tpu.memory_space<vmem>>, vector<1x32x256xf32>
    %1 = vector.shape_cast %0 : vector<1x32x256xf32> to vector<32x256xf32>
    %cst = arith.constant dense<0.000000e+00> : vector<256xf32>
    %2 = vector.multi_reduction <add>, %1, %cst [0] : vector<32x256xf32> to vector<256xf32>
    %3 = vector.shape_cast %2 : vector<256xf32> to vector<1x256xf32>
    %cst_2 = arith.constant 3.200000e+01 : f32
    %4 = vector.broadcast %cst_2 : f32 to vector<1x256xf32>
    %5 = arith.divf %3, %4 : vector<1x256xf32>
    %6 = vector.broadcast %5 : vector<1x256xf32> to vector<32x256xf32>
    %7 = arith.subf %1, %6 : vector<32x256xf32>
    %8 = arith.mulf %7, %7 : vector<32x256xf32>
    %cst_3 = arith.constant dense<0.000000e+00> : vector<256xf32>
    %9 = vector.multi_reduction <add>, %8, %cst_3 [0] : vector<32x256xf32> to vector<256xf32>
    %10 = vector.shape_cast %9 : vector<256xf32> to vector<1x256xf32>
    %cst_4 = arith.constant 3.200000e+01 : f32
    %11 = vector.broadcast %cst_4 : f32 to vector<1x256xf32>
    %12 = arith.divf %10, %11 : vector<1x256xf32>
    %cst_5 = arith.constant 9.99999997E-7 : f32
    %13 = vector.broadcast %cst_5 : f32 to vector<1x256xf32>
    %14 = arith.addf %12, %13 : vector<1x256xf32>
    %15 = math.rsqrt %14 : vector<1x256xf32>
    %16 = vector.broadcast %15 : vector<1x256xf32> to vector<32x256xf32>
    %17 = arith.mulf %7, %16 : vector<32x256xf32>
    %c0_6 = arith.constant 0 : index
    %c0_7 = arith.constant 0 : index
    %18 = vector.load %arg3[%c0_6, %c0_7] : memref<32x1xf32, #tpu.memory_space<vmem>>, vector<32x1xf32>
    %19 = vector.broadcast %18 : vector<32x1xf32> to vector<32x256xf32>
    %20 = arith.mulf %17, %19 : vector<32x256xf32>
    %c0_8 = arith.constant 0 : index
    %c0_9 = arith.constant 0 : index
    %21 = vector.load %arg4[%c0_8, %c0_9] : memref<32x1xf32, #tpu.memory_space<vmem>>, vector<32x1xf32>
    %22 = vector.broadcast %21 : vector<32x1xf32> to vector<32x256xf32>
    %23 = arith.addf %20, %22 : vector<32x256xf32>
    %c0_10 = arith.constant 0 : index
    %c0_11 = arith.constant 0 : index
    %24 = vector.load %arg5[%c0_10, %c0_11] : memref<8x32xf32, #tpu.memory_space<vmem>>, vector<8x32xf32>
    %cst_12 = arith.constant dense<0.000000e+00> : vector<8x256xf32>
    %25 = tpu.matmul %24, %23, %cst_12 {dimension_numbers = #tpu.dot_dimension_numbers<[1], [0], [0], [1], [0, 0, 1, 1], [], []>} : vector<8x32xf32>, vector<32x256xf32>, vector<8x256xf32> -> vector<8x256xf32>
    %c0_13 = arith.constant 0 : index
    %c0_14 = arith.constant 0 : index
    %26 = vector.load %arg6[%c0_13, %c0_14] : memref<8x1xf32, #tpu.memory_space<vmem>>, vector<8x1xf32>
    %27 = vector.broadcast %26 : vector<8x1xf32> to vector<8x256xf32>
    %28 = arith.addf %25, %27 : vector<8x256xf32>
    %cst_15 = arith.constant 5.000000e-01 : f32
    %29 = vector.broadcast %cst_15 : f32 to vector<8x256xf32>
    %30 = arith.mulf %29, %28 : vector<8x256xf32>
    %cst_16 = arith.constant 0.707106769 : f32
    %31 = vector.broadcast %cst_16 : f32 to vector<8x256xf32>
    %32 = arith.mulf %28, %31 : vector<8x256xf32>
    %33 = math.erf %32 : vector<8x256xf32>
    %cst_17 = arith.constant 1.000000e+00 : f32
    %34 = vector.broadcast %cst_17 : f32 to vector<8x256xf32>
    %35 = arith.addf %34, %33 : vector<8x256xf32>
    %36 = arith.mulf %30, %35 : vector<8x256xf32>
    %c0_18 = arith.constant 0 : index
    %c0_19 = arith.constant 0 : index
    %37 = vector.load %arg7[%c0_18, %c0_19] : memref<32x8xf32, #tpu.memory_space<vmem>>, vector<32x8xf32>
    %cst_20 = arith.constant dense<0.000000e+00> : vector<32x256xf32>
    %38 = tpu.matmul %37, %36, %cst_20 {dimension_numbers = #tpu.dot_dimension_numbers<[1], [0], [0], [1], [0, 0, 1, 1], [], []>} : vector<32x8xf32>, vector<8x256xf32>, vector<32x256xf32> -> vector<32x256xf32>
    %c0_21 = arith.constant 0 : index
    %c0_22 = arith.constant 0 : index
    %39 = vector.load %arg8[%c0_21, %c0_22] : memref<32x1xf32, #tpu.memory_space<vmem>>, vector<32x1xf32>
    %40 = vector.broadcast %39 : vector<32x1xf32> to vector<32x256xf32>
    %41 = arith.addf %38, %40 : vector<32x256xf32>
    %c0_23 = arith.constant 0 : index
    %c0_24 = arith.constant 0 : index
    %42 = vector.load %arg9[%c0_23, %c0_24] : memref<32x1xf32, #tpu.memory_space<vmem>>, vector<32x1xf32>
    %43 = vector.broadcast %42 : vector<32x1xf32> to vector<32x256xf32>
    %44 = arith.mulf %41, %43 : vector<32x256xf32>
    %45 = arith.addf %44, %1 : vector<32x256xf32>
    %c0_25 = arith.constant 0 : index
    %c0_26 = arith.constant 0 : index
    %c0_27 = arith.constant 0 : index
    %46 = vector.load %arg10[%c0_25, %c0_26, %c0_27] : memref<1x32x256xf32, #tpu.memory_space<vmem>>, vector<1x32x256xf32>
    %47 = vector.shape_cast %46 : vector<1x32x256xf32> to vector<32x256xf32>
    %48 = vector.shape_cast %45 : vector<32x256xf32> to vector<1x32x256xf32>
    tpu.vector_store %arg10[%c0_25, %c0_26, %c0_27], %48 {strides = array<i32>} : memref<1x32x256xf32, #tpu.memory_space<vmem>>, vector<1x32x256xf32>,
    return
  }
  func.func @transform_0(%arg0: i32, %arg1: i32) -> (i32, i32, i32) {
    %c0_i32 = arith.constant 0 : i32
    %c0_i32_0 = arith.constant 0 : i32
    return %arg0, %c0_i32, %arg1 : i32, i32, i32
  }
  func.func @transform_1(%arg0: i32, %arg1: i32) -> (i32, i32) {
    %c0_i32 = arith.constant 0 : i32
    %c0_i32_0 = arith.constant 0 : i32
    %c0_i32_1 = arith.constant 0 : i32
    return %c0_i32, %c0_i32_0 : i32, i32
  }
  func.func @transform_2(%arg0: i32, %arg1: i32) -> (i32, i32) {
    %c0_i32 = arith.constant 0 : i32
    %c0_i32_0 = arith.constant 0 : i32
    %c0_i32_1 = arith.constant 0 : i32
    return %c0_i32, %c0_i32_0 : i32, i32
  }
  func.func @transform_3(%arg0: i32, %arg1: i32) -> (i32, i32) {
    %c0_i32 = arith.constant 0 : i32
    %c0_i32_0 = arith.constant 0 : i32
    %c0_i32_1 = arith.constant 0 : i32
    return %c0_i32, %c0_i32_0 : i32, i32
  }
  func.func @transform_4(%arg0: i32, %arg1: i32) -> (i32, i32) {
    %c0_i32 = arith.constant 0 : i32
    %c0_i32_0 = arith.constant 0 : i32
    %c0_i32_1 = arith.constant 0 : i32
    return %c0_i32, %c0_i32_0 : i32, i32
  }
  func.func @transform_5(%arg0: i32, %arg1: i32) -> (i32, i32) {
    %c0_i32 = arith.constant 0 : i32
    %c0_i32_0 = arith.constant 0 : i32
    %c0_i32_1 = arith.constant 0 : i32
    return %c0_i32, %c0_i32_0 : i32, i32
  }
  func.func @transform_6(%arg0: i32, %arg1: i32) -> (i32, i32) {
    %c0_i32 = arith.constant 0 : i32
    %c0_i32_0 = arith.constant 0 : i32
    %c0_i32_1 = arith.constant 0 : i32
    return %c0_i32, %c0_i32_0 : i32, i32
  }
  func.func @transform_7(%arg0: i32, %arg1: i32) -> (i32, i32) {
    %c0_i32 = arith.constant 0 : i32
    %c0_i32_0 = arith.constant 0 : i32
    %c0_i32_1 = arith.constant 0 : i32
    return %c0_i32, %c0_i32_0 : i32, i32
  }
  func.func @transform_8(%arg0: i32, %arg1: i32) -> (i32, i32, i32) {
    %c0_i32 = arith.constant 0 : i32
    %c0_i32_0 = arith.constant 0 : i32
    return %arg0, %c0_i32, %arg1 : i32, i32, i32
  }
}

</mosaic_0001>

<bundles_post_ra>
// kernel: mlp_forward.1
= control target key start
LH: loop header
LB: loop body
LE: loop exit
PB: predicated region body
PF: predicated region fallthrough
CT: control target
= control target key end

     0   :  { %s976_s27 = smov 0   ;;  %s978_s28 = smov 0   ;;  %s1137_s0 = inlined_call_operand.vmem [shape: f32[2,32,256], index: 0, kind: input, shape index: {}]   ;;  %s1138_s1 = inlined_call_operand.vmem [shape: f32[32,1], index: 1, kind: input, shape index: {}]   ;;  %s1139_s2 = inlined_call_operand.vmem [shape: f32[32,1], index: 2, kind: input, shape index: {}]   ;;  %s1140_s3 = inlined_call_operand.vmem [shape: f32[8,32], index: 3, kind: input, shape index: {}]   ;;  %s1141_s4 = inlined_call_operand.vmem [shape: f32[8,1], index: 4, kind: input, shape index: {}]   ;;  %s1142_s5 = inlined_call_operand.vmem [shape: f32[32,8], index: 5, kind: input, shape index: {}]   ;;  %s1143_s6 = inlined_call_operand.vmem [shape: f32[32,1], index: 6, kind: input, shape index: {}]   ;;  %s1144_s7 = inlined_call_operand.vmem [shape: f32[32,1], index: 7, kind: input, shape index: {}]   ;;  %s1145_s8 = inlined_call_operand.vmem [shape: f32[2,32,256], index: 8, kind: output, shape index: {}]  }
   0x1   :  { %s980_s29 = smov 0  }
   0x2 LB: > { %s30_s30 = sadd.s32 1, %s923_s28  ;;  %p847_p0 = scmp.ge.s32.totalorder %s927_s29, 1  ;;  %s927_s29 = sphi %s980_s29, %s18_s29   ;;  %s923_s28 = sphi %s978_s28, %s1147_s28   ;;  %s919_s27 = sphi %s976_s27, %s1146_s27  }
   0x3   : > { %p32_p1 = scmp.ge.s32.totalorder %s30_s30, 2  ;;  %p283_p2 = scmp.lt.s32.totalorder %s927_s29, 3 }
   0x5   : > { %s1149_s30 = smov (%p32_p1, %s30_s30), 0  ;;  %p284_p3 = pnand %p847_p0, %p283_p2 }
   0x6   : > { %v454_v0 = vld [vmem:[%s1139_s2] sm:$0xff] (!%p284_p3)  ;;  %v929_v2 = vmov (!%p284_p3), 0   ;;  %v455_v3 = vld [vmem:[%s1139_s2 + $0x8] sm:$0xff] (!%p284_p3)  ;;  %p326_p4 = scmp.lt.s32.totalorder (!%p284_p3), %s919_s27, 1  ;;  %v425_v5 = vld [vmem:[%s1138_s1 + $0x18] sm:$0xff] (!%p284_p3)  ;;  %v930_v15 = vmov (!%p284_p3), 0.0  }
   0x7   : > { %287 = sbr.rel (%p284_p3) target bundleno = 622 (0x26e), region = 52  ;;  %v422_v1 = vld [vmem:[%s1138_s1] sm:$0xff] (!%p284_p3)  ;;  %896 = vset.pattern.permute.xlu1 (!%p284_p3), %v929_v2  ;;  %895 = vset.pattern.permute.xlu0 (!%p284_p3), %v929_v2  ;;  %v423_v4 = vld [vmem:[%s1138_s1 + $0x8] sm:$0xff] (!%p284_p3)  ;;  %v424_v6 = vld [vmem:[%s1138_s1 + $0x10] sm:$0xff] (!%p284_p3)  ;;  %vm493_vm0 = vcmask (!%p284_p3), 261120   ;;  %vm606_vm1 = vcmask (!%p284_p3), 64512  }
   0x8   : > { %460 = vperm.xlu1 (!%p284_p3), %896, %v454_v0   ;;  %428 = vperm.xlu0 (!%p284_p3), %895, %v422_v1   ;;  %v457_v7 = vld [vmem:[%s1139_s2 + $0x18] sm:$0xff] (!%p284_p3)  ;;  %v456_v8 = vld [vmem:[%s1139_s2 + $0x10] sm:$0xff] (!%p284_p3)  ;;  %v582_v9 = vld [vmem:[%s1143_s6] sm:$0xff] (!%p284_p3) }
   0x9   : > { %v487_v10 = vld [vmem:[%s1141_s4] sm:$0xff] (!%p284_p3)  ;;  %v584_v11 = vld [vmem:[%s1143_s6 + $0x10] sm:$0xff] (!%p284_p3)  ;;  %v583_v12 = vld [vmem:[%s1143_s6 + $0x8] sm:$0xff] (!%p284_p3)  ;;  %561 = vmatprep.mubr.f32.mxu0 (!%p284_p3), %v930_v15  ;;  %683 = vmatprep.mubr.f32.mxu1 (!%p284_p3), %v930_v15 }
   0xa   : > { %v708_v18 = vld [vmem:[%s1144_s7] sm:$0xff] (!%p284_p3)  ;;  %v585_v19 = vld [vmem:[%s1143_s6 + $0x18] sm:$0xff] (!%p284_p3)  ;;  %v710_v24 = vld [vmem:[%s1144_s7 + $0x10] sm:$0xff] (!%p284_p3) }
   0xb   : > { %v709_v25 = vld [vmem:[%s1144_s7 + $0x8] sm:$0xff] (!%p284_p3)  ;;  %v711_v30 = vld [vmem:[%s1144_s7 + $0x18] sm:$0xff] (!%p284_p3) }
   0xc   : > { %465 = vperm.xlu1 (!%p284_p3), %896, %v455_v3   ;;  %433 = vperm.xlu0 (!%p284_p3), %895, %v423_v4  }
   0xe   : > { %s1151_s27 = smov (!%p326_p4, %s919_s27), 1 }
   0xf   : > { %s859_s25 = sshll.u32 %s1151_s27, 6 }
  0x10   : > { %443 = vperm.xlu1 %896, %v425_v5   ;;  %438 = vperm.xlu0 %895, %v424_v6   ;;  %s333_s14 = scalar_lea.vmem %s1137_s0, %s859_s25  ;;  %s1110_s24 = scalar_lea.vmem %s1145_s8, %s859_s25 }
  0x11   : > { %v1038_v13 = vld [vmem:[%s333_s14] sm:$0xff]  ;;  %v1040_v14 = vld [vmem:[%s333_s14 + $0x10] sm:$0xff]  ;;  %v1044_v16 = vld [vmem:[%s333_s14 + $0x8] sm:$0xff] }
  0x12   : > { %v1046_v17 = vld [vmem:[%s333_s14 + $0x18] sm:$0xff]  ;;  %v353_v20 = vadd.f32 %v1040_v14, %v1038_v13  ;;  %v1056_v21 = vld [vmem:[%s333_s14 + $0x20] sm:$0xff]  ;;  %v1060_v23 = vld [vmem:[%s333_s14 + $0x28] sm:$0xff] }
  0x13   : > { %v362_v22 = vadd.f32 %v1046_v17, %v1044_v16  ;;  %v1069_v27 = vld [vmem:[%s333_s14 + $0x30] sm:$0xff]  ;;  %v1072_v29 = vld [vmem:[%s333_s14 + $0x38] sm:$0xff] }
  0x14   : > { %475 = vperm.xlu1 %896, %v457_v7   ;;  %470 = vperm.xlu0 %895, %v456_v8   ;;  %v354_v26 = vadd.f32 %v353_v20, %v1056_v21 }
  0x15   : > { %v363_v28 = vadd.f32 %v362_v22, %v1060_v23 }
  0x16   : > { %v355_v31 = vadd.f32 %v354_v26, %v1069_v27 }
  0x17   : > { %v364_v32 = vadd.f32 %v363_v28, %v1072_v29 }
  0x18   : > { %588 = vperm.xlu1 %896, %v582_v9   ;;  %490 = vperm.xlu0 %895, %v487_v10   ;;  %v356_v33 = vrot.slane %v355_v31, 4 }
  0x19   : > { %v365_v34 = vrot.slane %v364_v32, 4 }
  0x1a   : > { %v357_v35 = vadd.f32 %v356_v33, %v355_v31 }
  0x1b   : > { %v366_v36 = vadd.f32 %v365_v34, %v364_v32 }
  0x1c   : > { %598 = vperm.xlu1 %896, %v584_v11   ;;  %593 = vperm.xlu0 %895, %v583_v12   ;;  %v358_v37 = vrot.slane %v357_v35, 2 }
  0x1d   : > { %v367_v38 = vrot.slane %v366_v36, 2 }
  0x1e   : > { %v359_v39 = vadd.f32 %v358_v37, %v357_v35 }
  0x1f   : > { %v368_v40 = vadd.f32 %v367_v38, %v366_v36 }
  0x20   : > { %714 = vperm.xlu1 %896, %v708_v18   ;;  %603 = vperm.xlu0 %895, %v585_v19   ;;  %v360_v41 = vrot.slane %v359_v39, 1 }
  0x21   : > { %v369_v42 = vrot.slane %v368_v40, 1 }
  0x22   : > { %v361_v43 = vadd.f32 %v360_v41, %v359_v39 }
  0x23   : > { %v370_v44 = vadd.f32 %v369_v42, %v368_v40 }
  0x24   : > { %724 = vperm.xlu1 %896, %v710_v24   ;;  %719 = vperm.xlu0 %895, %v709_v25   ;;  %v372_v45 = vmul.f32 0.03125, %v361_v43 }
  0x25   : > { %v373_v46 = vmul.f32 0.03125, %v370_v44 }
  0x26   : > { %v374_v47 = vsub.f32 %v1038_v13, %v372_v45  ;;  %v376_v48 = vsub.f32 %v1040_v14, %v372_v45  ;;  %v378_v51 = vsub.f32 %v1056_v21, %v372_v45  ;;  %v380_v57 = vsub.f32 %v1069_v27, %v372_v45 }
  0x27   : > { %v375_v49 = vsub.f32 %v1044_v16, %v373_v46  ;;  %v377_v50 = vsub.f32 %v1046_v17, %v373_v46  ;;  %v379_v54 = vsub.f32 %v1060_v23, %v373_v46  ;;  %v381_v60 = vsub.f32 %v1072_v29, %v373_v46 }
  0x28   : > { %729 = vperm.xlu0 %895, %v711_v30   ;;  %v382_v52 = vmul.f32 %v374_v47, %v374_v47  ;;  %v384_v53 = vmul.f32 %v376_v48, %v376_v48  ;;  %v386_v58 = vmul.f32 %v378_v51, %v378_v51  ;;  %v388_v63 = vmul.f32 %v380_v57, %v380_v57 }
  0x29   : > { %v383_v55 = vmul.f32 %v375_v49, %v375_v49  ;;  %v385_v56 = vmul.f32 %v377_v50, %v377_v50  ;;  %v387_v61 = vmul.f32 %v379_v54, %v379_v54  ;;  %v389_v1 = vmul.f32 %v381_v60, %v381_v60 }
  0x2a   : > { %v390_v59 = vadd.f32 %v384_v53, %v382_v52 }
  0x2b   : > { %v399_v62 = vadd.f32 %v385_v56, %v383_v55 }
  0x2c   : > { %v391_v0 = vadd.f32 %v390_v59, %v386_v58 }
  0x2d   : > { %v400_v2 = vadd.f32 %v399_v62, %v387_v61 }
  0x2e   : > { %v392_v3 = vadd.f32 %v391_v0, %v388_v63 }
  0x2f   : > { %v401_v4 = vadd.f32 %v400_v2, %v389_v1 }
  0x30   : > { %v393_v5 = vrot.slane %v392_v3, 4 }
  0x31   : > { %v402_v6 = vrot.slane %v401_v4, 4 }
  0x32   : > { %v394_v7 = vadd.f32 %v393_v5, %v392_v3 }
  0x33   : > { %v403_v8 = vadd.f32 %v402_v6, %v401_v4  ;;  %v486_v4 = vld [vmem:[%s1140_s3] sm:$0xff] }
  0x34   : > { %v395_v9 = vrot.slane %v394_v7, 2 }
  0x35   : > { %v404_v10 = vrot.slane %v403_v8, 2 }
  0x36   : > { %v396_v11 = vadd.f32 %v395_v9, %v394_v7 }
  0x37   : > { %v405_v12 = vadd.f32 %v404_v10, %v403_v8 }
  0x38   : > { %v397_v18 = vrot.slane %v396_v11, 1 }
  0x39   : > { %v406_v19 = vrot.slane %v405_v12, 1 }
  0x3a   : > { %v398_v20 = vadd.f32 %v397_v18, %v396_v11 }
  0x3b   : > { %v407_v22 = vadd.f32 %v406_v19, %v405_v12 }
  0x3c   : > { %v408_v24 = vmul.f32 0.03125, %v398_v20 }
  0x3d   : > { %v409_v25 = vmul.f32 0.03125, %v407_v22 }
  0x3e   : > { %v410_v26 = vadd.f32 1e-06, %v408_v24 }
  0x3f   : > { %v411_v28 = vadd.f32 1e-06, %v409_v25 }
  0x40   : > { %897 = vrsqrt.f32 %v410_v26 }
  0x41   : > { %899 = vrsqrt.f32 %v411_v28  ;;  %v578_v28 = vld [vmem:[%s1142_s5] sm:$0xff] }
  0x4a   : > { %v898_v30 = vpop.eup %897 }
  0x4b   : > { %v900_v31 = vpop.eup %899  ;;  %v414_v34 = vmul.f32 %v898_v30, %v374_v47  ;;  %v416_v36 = vmul.f32 %v898_v30, %v376_v48  ;;  %v420_v44 = vmul.f32 %v898_v30, %v380_v57  ;;  %v418_v45 = vmul.f32 %v898_v30, %v378_v51  ;;  %v579_v30 = vld [vmem:[%s1142_s5 + $0x8] sm:$0xff] }
  0x4c   : > { %v415_v35 = vmul.f32 %v900_v31, %v375_v49  ;;  %v417_v37 = vmul.f32 %v900_v31, %v377_v50  ;;  %v421_v46 = vmul.f32 %v900_v31, %v381_v60  ;;  %v419_v52 = vmul.f32 %v900_v31, %v379_v54  ;;  %v580_v31 = vld [vmem:[%s1142_s5 + $0x10] sm:$0xff] }
  0x87   : > { %v461_v32 = vpop.permute.xlu1 %460  ;;  %v429_v33 = vpop.permute.xlu0 %428 }
  0x88   : > { %v446_v38 = vmul.f32 %v429_v33, %v414_v34  ;;  %v447_v39 = vmul.f32 %v429_v33, %v415_v35 }
  0x8a   : > { %v479_v59 = vadd.f32 %v461_v32, %v447_v39  ;;  %v478_v61 = vadd.f32 %v461_v32, %v446_v38  ;;  %v581_v32 = vld [vmem:[%s1142_s5 + $0x18] sm:$0xff] }
  0x8b   : > { %v466_v40 = vpop.permute.xlu1 %465  ;;  %v434_v41 = vpop.permute.xlu0 %433 }
  0x8c   : > { %v448_v42 = vmul.f32 %v434_v41, %v416_v36  ;;  %v449_v43 = vmul.f32 %v434_v41, %v417_v37 }
  0x8e   : > { %v481_v53 = vadd.f32 %v466_v40, %v449_v43  ;;  %v480_v55 = vadd.f32 %v466_v40, %v448_v42 }
  0x8f   : > { %v444_v56 = vpop.permute.xlu1 %443  ;;  %v439_v58 = vpop.permute.xlu0 %438 }
  0x90   : > { %v861_v47 = vpack.c.bf16 %v481_v53, %v479_v59  ;;  %v863_v49 = vpack.c.bf16 %v480_v55, %v478_v61  ;;  %v452_v48 = vmul.f32 %v444_v56, %v420_v44  ;;  %v453_v50 = vmul.f32 %v444_v56, %v421_v46 }
  0x91   : > { %v450_v62 = vmul.f32 %v439_v58, %v418_v45  ;;  %v451_v63 = vmul.f32 %v439_v58, %v419_v52 }
  0x92   : > { %862 = vmatprep.subr.bf16.mxu0 %v861_v47 }
  0x93   : > { %v476_v0 = vpop.permute.xlu1 %475  ;;  %v471_v1 = vpop.permute.xlu0 %470  ;;  %864 = vmatpush1.bf16.msra.mxu0 %v863_v49 }
  0x94   : > { %v484_v2 = vadd.f32 %v476_v0, %v452_v48  ;;  %v485_v57 = vadd.f32 %v476_v0, %v453_v50  ;;  %v482_v51 = vadd.f32 %v471_v1, %v450_v62  ;;  %v483_v60 = vadd.f32 %v471_v1, %v451_v63 }
  0x96   : > { %v865_v54 = vpack.c.bf16 %v485_v57, %v483_v60  ;;  %v867_v3 = vpack.c.bf16 %v484_v2, %v482_v51 }
  0x97   : > { %v491_v5 = vpop.permute.xlu0 %490  ;;  %v589_v33 = vpop.permute.xlu1 %588 }
  0x98   : > { %866 = vmatprep.subr.bf16.mxu0 %v865_v54 }
  0x99   : > { %868 = vmatpush1.bf16.msra.mxu0 %v867_v3 }
  0x9b   : > { %v594_v34 = vpop.permute.xlu0 %593  ;;  %v599_v35 = vpop.permute.xlu1 %598 }
  0x9c   : > { %852 = vmatmul.mubr.msk.f32.vlgmr.msra.gmra.mrb[0].mxu0 %vm493_vm0, %v486_v4 }
  0x9f   : > { %v604_v36 = vpop.permute.xlu0 %603  ;;  %v715_v40 = vpop.permute.xlu1 %714 }
  0xa3   : > { %v720_v52 = vpop.permute.xlu0 %719  ;;  %v725_v48 = vpop.permute.xlu1 %724 }
 0x16f   : > { %v563_v6 = vpop.f32.mrb[0].mxu0 }
 0x170   : > { %v564_v7 = vadd.f32 %v563_v6, %v491_v5  ;;  %v565_v8 = vpop.f32.mrb[1].mxu0 }
 0x171   : > { %v566_v9 = vadd.f32 %v565_v8, %v491_v5 }
 0x172   : > { %v570_v10 = vmul.f32 0.70710677, %v564_v7  ;;  %v568_v24 = vmul.f32 0.5, %v564_v7 }
 0x173   : > { %v571_v11 = vmul.f32 0.70710677, %v566_v9  ;;  %v569_v20 = vmul.f32 0.5, %v566_v9 }
 0x174   : > { %901 = verf.f32 %v570_v10 }
 0x175   : > { %903 = verf.f32 %v571_v11 }
 0x17e   : > { %v902_v12 = vpop.eup %901 }
 0x17f   : > { %v904_v18 = vpop.eup %903  ;;  %v574_v19 = vadd.f32 1.0, %v902_v12 }
 0x180   : > { %v575_v22 = vadd.f32 1.0, %v904_v18 }
 0x181   : > { %v576_v26 = vmul.f32 %v574_v19, %v568_v24 }
 0x182   : > { %v577_v25 = vmul.f32 %v575_v22, %v569_v20 }
 0x184   : > { %619 = vmatprep.subr.mxu1 %v577_v25 }
 0x185   : > { %620 = vmatpush1.msra.mxu1 %v576_v26 }
 0x186   : > { %853 = vmatmul.mubr.msk.f32.vlgmr.msra.gmra.mrb[0].mxu1 %vm606_vm1, %v578_v28 }
 0x187   : > { %689 = vmatprep.mubr.f32.mxu1 %v930_v15 }
 0x18a   : > { %854 = vmatmul.mubr.msk.f32.gmra.mrb[2].mxu1 %vm606_vm1, %v579_v30 }
 0x18b   : > { %695 = vmatprep.mubr.f32.mxu1 %v930_v15 }
 0x18e   : > { %855 = vmatmul.mubr.msk.f32.gmra.mrb[4].mxu1 %vm606_vm1, %v580_v31 }
 0x18f   : > { %701 = vmatprep.mubr.f32.mxu1 %v930_v15 }
 0x192   : > { %856 = vmatmul.mubr.msk.f32.gmra.mrb[6].mxu1 %vm606_vm1, %v581_v32 }
 0x259   : > { %v685_v37 = vpop.f32.mrb[0].mxu1 }
 0x25a   : > { %v686_v38 = vadd.f32 %v685_v37, %v589_v33  ;;  %v687_v39 = vpop.f32.mrb[1].mxu1 }
 0x25b   : > { %v688_v41 = vadd.f32 %v687_v39, %v589_v33 }
 0x25c   : > { %v732_v42 = vmul.f32 %v715_v40, %v686_v38 }
 0x25d   : > { %v733_v15 = vmul.f32 %v715_v40, %v688_v41  ;;  %v691_v43 = vpop.f32.mrb[2].mxu1 }
 0x25e   : > { %v740_v44 = vadd.f32 %v732_v42, %v1038_v13  ;;  %v692_v45 = vadd.f32 %v691_v43, %v594_v34  ;;  %v693_v46 = vpop.f32.mrb[3].mxu1 }
 0x25f   : > { %v741_v53 = vadd.f32 %v733_v15, %v1044_v16  ;;  %v694_v55 = vadd.f32 %v693_v46, %v594_v34 }
 0x260   : > { %748 = vst [vmem:[%s1110_s24] sm:$0xff] %v740_v44  ;;  %v734_v56 = vmul.f32 %v720_v52, %v692_v45 }
 0x261   : > { %749 = vst [vmem:[%s1110_s24 + $0x8] sm:$0xff] %v741_v53  ;;  %v735_v58 = vmul.f32 %v720_v52, %v694_v55  ;;  %v697_v59 = vpop.f32.mrb[4].mxu1 }
 0x262   : > { %v742_v61 = vadd.f32 %v734_v56, %v1040_v14  ;;  %v698_v47 = vadd.f32 %v697_v59, %v599_v35  ;;  %v699_v49 = vpop.f32.mrb[5].mxu1  ;;  %v730_v14 = vpop.permute.xlu0 %729 }
 0x263   : > { %v743_v13 = vadd.f32 %v735_v58, %v1046_v17  ;;  %v700_v50 = vadd.f32 %v699_v49, %v599_v35 }
 0x264   : > { %750 = vst [vmem:[%s1110_s24 + $0x10] sm:$0xff] %v742_v61  ;;  %v736_v62 = vmul.f32 %v725_v48, %v698_v47 }
 0x265   : > { %751 = vst [vmem:[%s1110_s24 + $0x18] sm:$0xff] %v743_v13  ;;  %v737_v16 = vmul.f32 %v725_v48, %v700_v50  ;;  %v703_v63 = vpop.f32.mrb[6].mxu1 }
 0x266   : > { %v744_v0 = vadd.f32 %v736_v62, %v1056_v21  ;;  %v704_v1 = vadd.f32 %v703_v63, %v604_v36  ;;  %v705_v2 = vpop.f32.mrb[7].mxu1 }
 0x267   : > { %v745_v57 = vadd.f32 %v737_v16, %v1060_v23  ;;  %v706_v51 = vadd.f32 %v705_v2, %v604_v36 }
 0x268   : > { %752 = vst [vmem:[%s1110_s24 + $0x20] sm:$0xff] %v744_v0  ;;  %v738_v60 = vmul.f32 %v730_v14, %v704_v1 }
 0x269   : > { %753 = vst [vmem:[%s1110_s24 + $0x28] sm:$0xff] %v745_v57  ;;  %v739_v17 = vmul.f32 %v730_v14, %v706_v51 }
 0x26a   : > { %v746_v54 = vadd.f32 %v738_v60, %v1069_v27 }
 0x26b   : > { %v747_v3 = vadd.f32 %v739_v17, %v1072_v29 }
 0x26c   : > { %754 = vst [vmem:[%s1110_s24 + $0x30] sm:$0xff] %v746_v54 }
 0x26d   : > { %755 = vst [vmem:[%s1110_s24 + $0x38] sm:$0xff] %v747_v3 }
 0x26e PF: > { %s18_s29 = sadd.s32 1, %s927_s29   ;;  %s1146_s27 = smov %s923_s28 }
 0x26f   : > { %p15_p5 = scmp.ge.s32.totalorder %s18_s29, 4   ;;  %s1147_s28 = smov %s1149_s30 }
 0x271   :  { %17 = sbr.rel (!%p15_p5) target bundleno = 2 (0x2), region = 82 }

</bundles_post_ra>
